<compile_context>
chip_gen: v5e
topology: v5e:2x2
jax: 0.10.0
libtpu: 0.0.40
codegen_flags: <defaults>
</compile_context>

<pallas_src>
import jax
import jax.numpy as jnp
from jax import lax
from jax.experimental import pallas as pl
from jax.experimental.pallas import tpu as pltpu


def _round_up(n, m):
    return ((n + m - 1) // m) * m


def ann_kernel(x_ref, w1_ref, b1_ref, w2_ref, b2_ref, o_ref):
    # Layer 1 on the MXU: bf16 inputs, f32 accumulate. [TILE_B,H]@[H,H2P]
    h = jnp.dot(x_ref[...], w1_ref[...], preferred_element_type=jnp.float32)
    h = jnp.maximum(h + b1_ref[...], 0.0)          # bias + ReLU in f32 (VPU)

    # Dropout(p=0.3): identity in eval / inference mode.

    # Layer 2: contract the hidden axis of h against the w2 row.  This yields a
    # lane-dense (1, TILE_B) result directly (no N=1 MXU matmul, no 1-lane-wide
    # masked stores, no awkward [H2,1] column operand).
    y = lax.dot_general(
        w2_ref[...], h,
        dimension_numbers=(((1,), (1,)), ((), ())),
        preferred_element_type=jnp.float32)        # (1, TILE_B)
    y = jnp.maximum(y + b2_ref[0, 0], 0.0)         # b2 scalar from SMEM
    o_ref[...] = y[None]                           # (1, 1, TILE_B)


def ann_forward(x, w1, b1, w2, b2, *, tile_b=512):
    """ANNModel forward.

    x : [B, H]  float32
    w1: [H, H2] float32  (transposed torch linear1.weight)
    b1: [1, H2] float32
    w2: [H2, 1] float32  (transposed torch linear2.weight)
    b2: [1, 1]  float32
    returns [B, 1] float32
    """
    B, H = x.shape
    H2 = w1.shape[1]
    H2P = _round_up(max(H2, 128), 128)             # pad hidden dim to full lanes

    # Effective batch tile: multiple of 8, no larger than needed for this B.
    tb = _round_up(min(tile_b, _round_up(B, 8)), 8)
    B_pad = _round_up(B, tb)
    num_tiles = B_pad // tb

    # --- parameter prep: zero-pad hidden dim; w1/x in bf16 for the MXU ---
    w1p = jnp.zeros((H, H2P), jnp.bfloat16).at[:, :H2].set(w1.astype(jnp.bfloat16))
    b1p = jnp.zeros((1, H2P), jnp.float32).at[:, :H2].set(b1.reshape(1, H2))
    w2p = jnp.zeros((1, H2P), jnp.float32).at[:, :H2].set(w2.reshape(1, H2))
    b2p = b2.reshape(1, 1).astype(jnp.float32)

    # --- activation prep: pad batch to a tile multiple, cast to bf16 ---
    xp = jnp.zeros((B_pad, H), jnp.bfloat16).at[:B, :].set(x.astype(jnp.bfloat16))

    out = pl.pallas_call(
        ann_kernel,
        out_shape=jax.ShapeDtypeStruct((num_tiles, 1, tb), jnp.float32),
        grid_spec=pltpu.PrefetchScalarGridSpec(
            num_scalar_prefetch=0,
            grid=(num_tiles,),
            in_specs=[
                pl.BlockSpec((tb, H), lambda i: (i, 0)),        # x tile (pipelined)
                pl.BlockSpec((H, H2P), lambda i: (0, 0)),       # w1 (VMEM resident)
                pl.BlockSpec((1, H2P), lambda i: (0, 0)),       # b1 (VMEM resident)
                pl.BlockSpec((1, H2P), lambda i: (0, 0)),       # w2 row (VMEM resident)
                pl.BlockSpec(memory_space=pltpu.MemorySpace.SMEM),  # b2 scalar
            ],
            out_specs=pl.BlockSpec((1, 1, tb), lambda i: (i, 0, 0)),
        ),
        compiler_params=pltpu.CompilerParams(
            dimension_semantics=("parallel",),      # megacore-shard batch on v7x
        ),
    )(xp, w1p, b1p, w2p, b2p)

    # Lane j of tile i is batch row i*tb + j.
    return out.reshape(B_pad)[:B].reshape(B, 1)


def init_params(hidden_size, key):
    """Deterministic init mirroring nn.Linear shapes (Kaiming-uniform-ish)."""
    h2 = hidden_size // 2
    k1, k2, k3, k4 = jax.random.split(key, 4)
    lim1 = 1.0 / jnp.sqrt(hidden_size)
    lim2 = 1.0 / jnp.sqrt(h2)
    # torch stores weight as [out, in]; we keep [in, out] for the kernel.
    w1 = jax.random.uniform(k1, (hidden_size, h2), jnp.float32, -lim1, lim1)
    b1 = jax.random.uniform(k2, (1, h2), jnp.float32, -lim1, lim1)
    w2 = jax.random.uniform(k3, (h2, 1), jnp.float32, -lim2, lim2)
    b2 = jax.random.uniform(k4, (1, 1), jnp.float32, -lim2, lim2)
    return w1, b1, w2, b2


if __name__ == "__main__":
    key = jax.random.PRNGKey(0)
    kx, kp = jax.random.split(key)

    batch = 24           # > tile_b below, so the batch grid really iterates
    hidden_size = 32

    x = jax.random.normal(kx, (batch, hidden_size), jnp.float32)
    w1, b1, w2, b2 = init_params(hidden_size, kp)

    out = ann_forward(x, w1, b1, w2, b2, tile_b=8)
    out = jax.block_until_ready(out)

    # Pure-JAX reference (eval-mode dropout = identity), matching the kernel's
    # bf16 layer-1 inputs.
    xb = x.astype(jnp.bfloat16).astype(jnp.float32)
    w1b = w1.astype(jnp.bfloat16).astype(jnp.float32)
    h_ref = jnp.maximum(xb @ w1b + b1, 0.0)
    ref = jnp.maximum(h_ref @ w2 + b2, 0.0)

    assert out.shape == (batch, 1)
    assert jnp.allclose(out, ref, atol=1e-3, rtol=1e-3), "mismatch vs reference"

    print("KERNEL_OK")
</pallas_src>

<mosaic_0001>
module attributes {stable_mosaic.version = 11 : i64} {
  func.func @ann_kernel(%arg0: i32, %arg1: memref<8x32xbf16, #tpu.memory_space<vmem>>, %arg2: memref<32x128xbf16, #tpu.memory_space<vmem>>, %arg3: memref<1x128xf32, #tpu.memory_space<vmem>>, %arg4: memref<1x128xf32, #tpu.memory_space<vmem>>, %arg5: memref<1x1xf32, #tpu.memory_space<smem>>, %arg6: memref<1x1x8xf32, #tpu.memory_space<vmem>>) attributes {dimension_semantics = [#tpu.dimension_semantics<parallel>], iteration_bounds = array<i64: 3>, scalar_prefetch = 0 : i64, scratch_operands = 0 : i64, tpu.core_type = #tpu.core_type<tc>, window_params = [{transform_indices = @transform_0, window_bounds = array<i64: 8, 32>}, {pipeline_mode = #tpu.pipeline_mode<synchronous>, transform_indices = @transform_1, window_bounds = array<i64: 32, 128>}, {pipeline_mode = #tpu.pipeline_mode<synchronous>, transform_indices = @transform_2, window_bounds = array<i64: 1, 128>}, {pipeline_mode = #tpu.pipeline_mode<synchronous>, transform_indices = @transform_3, window_bounds = array<i64: 1, 128>}, {transform_indices = @transform_4, window_bounds = array<i64: 1, 1>}, {transform_indices = @transform_5, window_bounds = array<i64: 1, 1, 8>}]} {
    %c0 = arith.constant 0 : index
    %c0_0 = arith.constant 0 : index
    %0 = vector.load %arg1[%c0, %c0_0] : memref<8x32xbf16, #tpu.memory_space<vmem>>, vector<8x32xbf16>
    %c0_1 = arith.constant 0 : index
    %c0_2 = arith.constant 0 : index
    %1 = vector.load %arg2[%c0_1, %c0_2] : memref<32x128xbf16, #tpu.memory_space<vmem>>, vector<32x128xbf16>
    %cst = arith.constant dense<0.000000e+00> : vector<8x128xf32>
    %2 = tpu.matmul %0, %1, %cst {dimension_numbers = #tpu.dot_dimension_numbers<[1], [0], [0], [1], [0, 0, 1, 1], [], []>} : vector<8x32xbf16>, vector<32x128xbf16>, vector<8x128xf32> -> vector<8x128xf32>
    %c0_3 = arith.constant 0 : index
    %c0_4 = arith.constant 0 : index
    %3 = vector.load %arg3[%c0_3, %c0_4] : memref<1x128xf32, #tpu.memory_space<vmem>>, vector<1x128xf32>
    %4 = vector.broadcast %3 : vector<1x128xf32> to vector<8x128xf32>
    %5 = arith.addf %2, %4 : vector<8x128xf32>
    %cst_5 = arith.constant 0.000000e+00 : f32
    %6 = vector.broadcast %cst_5 : f32 to vector<8x128xf32>
    %7 = arith.maximumf %5, %6 : vector<8x128xf32>
    %c0_6 = arith.constant 0 : index
    %c0_7 = arith.constant 0 : index
    %8 = vector.load %arg4[%c0_6, %c0_7] : memref<1x128xf32, #tpu.memory_space<vmem>>, vector<1x128xf32>
    %cst_8 = arith.constant dense<0.000000e+00> : vector<1x8xf32>
    %9 = tpu.matmul %8, %7, %cst_8 {dimension_numbers = #tpu.dot_dimension_numbers<[1], [1], [0], [0], [0, 0, 1, 0], [], []>} : vector<1x128xf32>, vector<8x128xf32>, vector<1x8xf32> -> vector<1x8xf32>
    %c0_9 = arith.constant 0 : index
    %c0_10 = arith.constant 0 : index
    %10 = memref.load %arg5[%c0_9, %c0_10] : memref<1x1xf32, #tpu.memory_space<smem>>
    %11 = vector.broadcast %10 : f32 to vector<1x8xf32>
    %12 = arith.addf %9, %11 : vector<1x8xf32>
    %cst_11 = arith.constant 0.000000e+00 : f32
    %13 = vector.broadcast %cst_11 : f32 to vector<1x8xf32>
    %14 = arith.maximumf %12, %13 : vector<1x8xf32>
    %15 = vector.shape_cast %14 : vector<1x8xf32> to vector<1x1x8xf32>
    %c0_12 = arith.constant 0 : index
    %c0_13 = arith.constant 0 : index
    %c0_14 = arith.constant 0 : index
    %16 = vector.load %arg6[%c0_12, %c0_13, %c0_14] : memref<1x1x8xf32, #tpu.memory_space<vmem>>, vector<1x1x8xf32>
    tpu.vector_store %arg6[%c0_12, %c0_13, %c0_14], %15 {strides = array<i32>} : memref<1x1x8xf32, #tpu.memory_space<vmem>>, vector<1x1x8xf32>,
    return
  }
  func.func @transform_0(%arg0: i32) -> (i32, i32) {
    %c0_i32 = arith.constant 0 : i32
    %c0_i32_0 = arith.constant 0 : i32
    return %arg0, %c0_i32 : i32, i32
  }
  func.func @transform_1(%arg0: i32) -> (i32, i32) {
    %c0_i32 = arith.constant 0 : i32
    %c0_i32_0 = arith.constant 0 : i32
    %c0_i32_1 = arith.constant 0 : i32
    return %c0_i32, %c0_i32_0 : i32, i32
  }
  func.func @transform_2(%arg0: i32) -> (i32, i32) {
    %c0_i32 = arith.constant 0 : i32
    %c0_i32_0 = arith.constant 0 : i32
    %c0_i32_1 = arith.constant 0 : i32
    return %c0_i32, %c0_i32_0 : i32, i32
  }
  func.func @transform_3(%arg0: i32) -> (i32, i32) {
    %c0_i32 = arith.constant 0 : i32
    %c0_i32_0 = arith.constant 0 : i32
    %c0_i32_1 = arith.constant 0 : i32
    return %c0_i32, %c0_i32_0 : i32, i32
  }
  func.func @transform_4(%arg0: i32) -> (i32, i32) {
    %c0_i32 = arith.constant 0 : i32
    %c0_i32_0 = arith.constant 0 : i32
    %c0_i32_1 = arith.constant 0 : i32
    return %c0_i32, %c0_i32_0 : i32, i32
  }
  func.func @transform_5(%arg0: i32) -> (i32, i32, i32) {
    %c0_i32 = arith.constant 0 : i32
    %c0_i32_0 = arith.constant 0 : i32
    %c0_i32_1 = arith.constant 0 : i32
    return %arg0, %c0_i32, %c0_i32_0 : i32, i32, i32
  }
}

</mosaic_0001>

<bundles_post_ra>
// kernel: tpu_custom_call.1
= control target key start
LH: loop header
LB: loop body
LE: loop exit
PB: predicated region body
PF: predicated region fallthrough
CT: control target
= control target key end

     0   :  { %s805_s0 = inlined_call_operand.hbm [shape: bf16[24,32], index: 0, kind: input, shape index: {}]   ;;  %s806_s1 = inlined_call_operand.hbm [shape: bf16[32,128], index: 1, kind: input, shape index: {}]   ;;  %s807_s2 = inlined_call_operand.vmem [shape: f32[1,128], index: 2, kind: input, shape index: {}]   ;;  %s808_s3 = inlined_call_operand.vmem [shape: f32[1,128], index: 3, kind: input, shape index: {}]   ;;  %s809_s4 = inlined_call_operand.<no memory space> [shape: f32[1,1], index: 4, kind: input, shape index: {}]   ;;  %s810_s5 = inlined_call_operand.hbm [shape: f32[3,1,8], index: 5, kind: output, shape index: {}]  }
   0x1   :  { %10 = sst [smem:[#allocation2]] %s809_s4 }
   0x2   :  { %11 = vsyncpa [#allocation4], 0 }
   0x3   :  { %13 = vsyncpa [#allocation4 + $0x1], 0 }
   0x4   :  { %14 = vsyncpa [#allocation7], 0 }
   0x5   :  { %15 = vsyncpa [#allocation5], 0 }
   0x6   :  { %17 = vsyncpa [#allocation5 + $0x1], 0  ;;  %s664_s20 = smov 0   ;;  %s666_s21 = smov 0  }
   0x7   :  { %s668_s22 = smov 0   ;;  %s670_s23 = smov 0  }
   0x8 LB: > { %s175_s25 = sshll.u32 %s806_s1, 4  ;;  %s688_s26 = sadd.s32 4294967295, %s626_s23   ;;  %s626_s23 = sphi %s670_s23, %s819_s23   ;;  %s622_s22 = sphi %s668_s22, %s818_s22   ;;  %s618_s21 = sphi %s666_s21, %s817_s21   ;;  %s614_s20 = sphi %s664_s20, %s816_s20   ;;  %s176_s25 = int_to_ptr.hbm [resolvable:$true] %s175_s25 }
   0x9   : > { %p415_p0 = scmp.ge.s32.totalorder %s626_s23, 1  ;;  %p44_p1 = scmp.eq.s32.totalorder %s688_s26, 0 }
   0xa   : > { %p164_p2 = scmp.lt.s32.totalorder %s626_s23, 4  ;;  %s628_s28 = smov [#allocation6]  }
   0xb   : > { %s177_s29 = sshll.u32 %s628_s28, 4  ;;  %s629_s30 = smov 64   ;;  %s178_s29 = int_to_ptr.vmem [resolvable:$true] %s177_s29 }
   0xc   : > { %p693_p3 = pnand %p415_p0, %p164_p2  ;;  %s630_s6 = smov 4  }
   0xd   : > { %s414_s7 = sadd.s32 4294967294, %s626_s23   ;;  %s703_s8 = sadd.s32 1, %s626_s23  }
   0xe   : > { %p444_p4 = pneg %p693_p3  ;;  %s30_s9 = sadd.s32 1, %s622_s22 }
   0xf   : > { %s27_s10 = ssub.s32 %s626_s23, %s703_s8  ;;  %p37_p6 = scmp.ne.s32.totalorder %s622_s22, %s618_s21 }
  0x10   : > { %p445_p5 = pnand %p444_p4, %p44_p1  ;;  %p28_p7 = scmp.eq.s32.totalorder %s27_s10, 0 }
  0x11   : > { %p38_p8 = scmp.eq.s32.totalorder %s626_s23, 0  ;;  %p43_p9 = scmp.ne.s32.totalorder %s618_s21, %s614_s20 }
  0x12   : > { %447 = dma.hbm_to_vmem [thread:$0]  (!%p445_p5), %s176_s25, 256, %s178_s29, [#allocation7], %s629_s30, %s629_s30, %s630_s6  }
  0x13   : > { %p151_p10 = scmp.eq.s32.totalorder %s688_s26, 2  ;;  %p719_p11 = por %p44_p1, %p43_p9 }
  0x14   : > { %s715_s11 = scalar_select %p28_p7, %s622_s22, %s30_s9  }
  0x15   : > { %p723_p12 = por %p151_p10, %p37_p6  ;;  %p157_p13 = scmp.eq.s32.totalorder %s414_s7, 2 }
  0x16   : > { %p39_p0 = por %p38_p8, %p37_p6  ;;  %s200_s14 = sand.u32 1, %s622_s22  }
  0x17   : > { %p728_p2 = por %p157_p13, %p43_p9  ;;  %p457_p4 = scmp.lt.s32.totalorder %s626_s23, 3 }
  0x18   : > { %s418_s16 = sshll.u32 %s200_s14, 2  ;;  %s419_s17 = sshll.u32 %s626_s23, 2 }
  0x19   : > { %s208_s4 = scalar_lea.hbm %s805_s0, %s419_s17  ;;  %s204_s25 = scalar_lea.vmem [#allocation3], %s418_s16 }
  0x1a   : > { %s210_s24 = sshll.u32 %s208_s4, 4  ;;  %s212_s28 = sshll.u32 %s204_s25, 4  ;;  %s211_s24 = int_to_ptr.hbm [resolvable:$true] %s210_s24  ;;  %s213_s28 = int_to_ptr.vmem [resolvable:$true] %s212_s28 }
  0x1b   : > { %p737_p5 = pnand %p457_p4, %p39_p0  ;;  %s201_s30 = scalar_lea.sflag [#allocation4], %s200_s14 }
  0x1c   : > { %s526_s6 = sshra.s32 %s211_s24, 4  ;;  %s533_s16 = scalar_lea.hbm %s805_s0, 12  ;;  %s527_s6 = int_to_ptr.hbm [resolvable:$true] %s526_s6 }
  0x1d   : > { %s528_s7 = scalar_lea.hbm %s527_s6, 4  ;;  %p530_p7 = pneg %p737_p5 }
  0x1e   : > { %p529_p6 = scmp.ne.s32.totalorder %s527_s6, %s528_s7  ;;  %p534_p10 = scmp.lt.s32.totalorder %s527_s6, %s805_s0 }
  0x1f   : > { %p535_p13 = scmp.lt.s32.totalorder %s533_s16, %s528_s7 }
  0x20   : > { %p531_p8 = pnand %p530_p7, %p529_p6 }
  0x21   : > { %p536_p0 = por %p535_p13, %p534_p10 }
  0x22   : > { %p532_p9 = pneg %p531_p8 }
  0x24   : > { %p537_p4 = pnand %p536_p0, %p532_p9 }
  0x26   : > { %540 = shalt.err (!%p537_p4)
}
  0x27   : > { %451 = dma.hbm_to_vmem [thread:$0]  (!%p737_p5), %s211_s24, 64, %s213_s28, %s201_s30  }
  0x28   : > { %221 = sbr.rel (%p693_p3) target bundleno = 322 (0x142), region = 40  ;;  %s754_s14 = sand.u32 (!%p693_p3), 1, %s618_s21  }
  0x29   : > { %s421_s19 = sshll.u32 (!%p693_p3), %s754_s14, 2  ;;  %s224_s4 = scalar_lea.sflag (!%p693_p3), [#allocation4], %s754_s14 }
  0x2a   : > { %s227_s25 = scalar_lea.vmem (!%p693_p3), [#allocation3], %s421_s19 }
  0x2d   : > { %601 = dma.done.wait (%p719_p11), %s224_s4, 64  }
  0x2e   : > { %603 = vsyncadd (%p719_p11), %s224_s4, 4294967232 }
  0x2f   : > { %605 = dma.done.wait (%p44_p1), [#allocation7], 256  }
  0x30   : > { %607 = vsyncadd (%p44_p1), [#allocation7], 4294967040  ;;  %v435_v0 = vld [vmem:[#allocation6 + $0x8] sm:$0xff]  ;;  %v434_v1 = vld [vmem:[#allocation6] sm:$0xff]  ;;  %vm281_vm0 = vcmask 261120   ;;  %s300_s29 = sld [smem:[#allocation2]]  ;;  %s334_s7 = scalar_lea.hbm %s810_s5, %s688_s26 }
  0x31   : > { %291 = vmatpush.bf16.msra.mxu0 %v435_v0  ;;  %v260_v2 = vld [vmem:[%s227_s25] sm:$0xf]  ;;  %s258_s9 = scalar_lea.vmem [#allocation8], %s754_s14  ;;  %s338_s16 = sshll.u32 %s334_s7, 4  ;;  %vm323_vm1 = vcmask 57344   ;;  %s339_s16 = int_to_ptr.hbm [resolvable:$true] %s338_s16 }
  0x32   : > { %v495_v3 = vld [vmem:[%s807_s2] ss:$0 sm:$0xff]  ;;  %s336_s10 = sshll.u32 %s258_s9, 4  ;;  %s326_s17 = scalar_lea.sflag [#allocation5], %s754_s14  ;;  %s337_s10 = int_to_ptr.vmem [resolvable:$true] %s336_s10 }
  0x33   : > { %v299_v7 = vld [vmem:[%s808_s3] sm:$0x1]  ;;  %s570_s18 = sshra.s32 %s339_s16, 4  ;;  %s576_s25 = scalar_lea.hbm %s810_s5, 3  ;;  %s571_s18 = int_to_ptr.hbm [resolvable:$true] %s570_s18 }
  0x34   : > { %s572_s19 = scalar_lea.hbm %s571_s18, 1  ;;  %p577_p5 = scmp.lt.s32.totalorder %s571_s18, %s810_s5 }
  0x35   : > { %292 = vmatpush.bf16.msra.mxu0 %v434_v1  ;;  %p573_p1 = scmp.ne.s32.totalorder %s571_s18, %s572_s19  ;;  %p578_p6 = scmp.lt.s32.totalorder %s576_s25, %s572_s19 }
  0x36   : > { %v301_v9 = vstv %s300_s29 }
  0x37   : > { %p574_p3 = pnand %p573_p1, %p723_p12  ;;  %p579_p7 = por %p578_p6, %p577_p5 }
  0x38   : > { %431 = vmatmul.msk.bf16.vlgmr.msra.gmra.mxu0 %vm281_vm0, %v260_v2 }
  0x39   : > { %p575_p11 = pneg %p574_p3 }
  0x3b   : > { %p580_p8 = pnand %p579_p7, %p575_p11 }
  0xb5   : > { %v294_v4 = vpop.f32.mrf.mxu0 }
  0xb6   : > { %v295_v5 = vadd.f32 %v495_v3, %v294_v4 }
  0xb8   : > { %v298_v6 = vmax.f32 %v295_v5, 0.0 }
  0xba   : > { %317 = vmatpush.xpose.msra.mxu1 %v298_v6 }
  0xbd   : > { %v296_v8 = vpop.f32.mrf.mxu0  ;;  %318 = vmatmul.f32.vlgmr.msra.gmra.mxu1 %v299_v7 }
 0x13a   : > { %v319_v10 = vpop.f32.mrf.mxu1 }
 0x13b   : > { %v320_v11 = vadd.f32 %v319_v10, %v301_v9 }
 0x13d   : > { %v322_v12 = vmax.f32 %v320_v11, 0.0 }
 0x13f   : > { %324 = vst.msk [vmem:[%s258_s9] sm:$0x1] %vm323_vm1, %v322_v12 }
 0x140   : > { %583 = shalt.err (!%p580_p8)
}
 0x141   : > { %442 = dma.vmem_to_hbm [thread:$0]  (%p723_p12), %s337_s10, 16, %s339_s16, %s326_s17  }
 0x142 PF: > { %p459_p9 = scmp.ge.s32.totalorder %s626_s23, 2  ;;  %s350_s14 = sand.u32 1, %s614_s20  }
 0x143   : > { %s351_s12 = scalar_lea.sflag [#allocation5], %s350_s14 }
 0x144   : > { %p453_p10 = pnand %p459_p9, %p728_p2 }
 0x146   : > { %p454_p13 = pneg %p453_p10 }
 0x148   : > { %609 = dma.done.wait (%p454_p13), %s351_s12, 16  }
 0x149   : > { %611 = vsyncadd (%p454_p13), %s351_s12, 4294967280  ;;  %p20_p0 = scmp.ge.s32.totalorder %s703_s8, 5   ;;  %s816_s20 = smov %s618_s21 }
 0x14a   : > { %s817_s21 = smov %s622_s22  ;;  %s818_s22 = smov %s715_s11 }
 0x14b   : > { %s819_s23 = smov %s703_s8  ;;  %22 = sbr.rel (!%p20_p0) target bundleno = 8 (0x8), region = 89 }
 0x150   :  { %356 = vsyncpa [#allocation4], 1 }
 0x151   :  { %358 = vsyncpa [#allocation4 + $0x1], 1 }
 0x152   :  { %359 = vsyncpa [#allocation7], 1 }
 0x153   :  { %360 = vsyncpa [#allocation5], 1 }
 0x154   :  { %362 = vsyncpa [#allocation5 + $0x1], 1 }

</bundles_post_ra>
